<compile_context>
chip_gen: v5e
topology: v5e:2x2
jax: 0.10.0
libtpu: 0.0.40
codegen_flags: <defaults>
</compile_context>

<pallas_src>
import functools

import jax
import jax.numpy as jnp
from jax import lax
from jax.experimental import pallas as pl
from jax.experimental.pallas import tpu as pltpu

EPS = 1e-5
LANE = 128
VMEM_LIMIT_BYTES = 48 * 1024 * 1024    # <= v7x physical 64 MiB; fine on v5e/v6e
VMEM_BUDGET_BYTES = 32 * 1024 * 1024   # working-set target used to derive tm


# ----------------------------- Pallas kernels ------------------------------

def _matmul_stats_kernel(p_ref, w_ref, raw_ref, sum_ref, ssq_ref):
    """One MXU pass per row tile: raw conv tile (bf16) + per-tile BN partials."""
    acc = jnp.dot(p_ref[...], w_ref[...], preferred_element_type=jnp.float32)
    raw_ref[...] = acc.astype(raw_ref.dtype)
    # Padded M rows of the patch tile are zero => contribute 0 to both sums.
    s = jnp.sum(acc, axis=0, keepdims=True)          # (1, c_pad)
    q = jnp.sum(acc * acc, axis=0, keepdims=True)
    # Output block is (8, c_pad) to satisfy the (8, 128) tiling constraint;
    # the single partial row is replicated across the 8 sublanes.
    sum_ref[...] = jnp.broadcast_to(s, sum_ref.shape)
    ssq_ref[...] = jnp.broadcast_to(q, ssq_ref.shape)


def _bn_relu_kernel(raw_ref, scale_ref, shift_ref, o_ref):
    """out = relu(raw * scale + shift)  (stage-1 BN + ReLU, bf16 out)."""
    x = raw_ref[...].astype(jnp.float32)
    y = x * scale_ref[...] + shift_ref[...]
    o_ref[...] = jnp.maximum(y, 0.0).astype(o_ref.dtype)


def _bn_add_relu_kernel(raw_ref, scale_ref, shift_ref, sc_ref, o_ref):
    """out = relu(raw * scale + shift + identity_shortcut)."""
    x = raw_ref[...].astype(jnp.float32)
    y = x * scale_ref[...] + shift_ref[...] + sc_ref[...].astype(jnp.float32)
    o_ref[...] = jnp.maximum(y, 0.0).astype(o_ref.dtype)


def _bn2_proj_relu_kernel(raw_ref, scale_ref, shift_ref,
                          sraw_ref, sscale_ref, sshift_ref, o_ref):
    """out = relu(bn2(conv2) + bn_s(proj_conv))."""
    x = raw_ref[...].astype(jnp.float32)
    s = sraw_ref[...].astype(jnp.float32)
    y = (x * scale_ref[...] + shift_ref[...]
         + s * sscale_ref[...] + sshift_ref[...])
    o_ref[...] = jnp.maximum(y, 0.0).astype(o_ref.dtype)


# ------------------------------ JAX glue ------------------------------------

def _round_up(x, m):
    return ((x + m - 1) // m) * m


def _pad_to(a, rows, cols):
    return jnp.pad(a, ((0, rows - a.shape[0]), (0, cols - a.shape[1])))


def _row_spec(tm, cols):
    return pl.BlockSpec((tm, cols), lambda m: (m, 0))


def _full_spec(shape):
    # block == full array -> resident in VMEM across the whole grid
    return pl.BlockSpec(shape, lambda m: (0, 0))


def _conv_matmul_stats(p, w, tm, m_pad, k_pad, c_pad):
    """conv-as-matmul, single pass: raw bf16 output + per-tile partial stats."""
    n_mtiles = m_pad // tm
    flops = 2 * m_pad * k_pad * c_pad
    bytes_accessed = (m_pad * k_pad * p.dtype.itemsize
                      + k_pad * c_pad * w.dtype.itemsize
                      + m_pad * c_pad * 2
                      + 2 * n_mtiles * 8 * c_pad * 4)
    return pl.pallas_call(
        _matmul_stats_kernel,
        out_shape=(
            jax.ShapeDtypeStruct((m_pad, c_pad), jnp.bfloat16),
            jax.ShapeDtypeStruct((n_mtiles * 8, c_pad), jnp.float32),
            jax.ShapeDtypeStruct((n_mtiles * 8, c_pad), jnp.float32),
        ),
        grid=(n_mtiles,),
        in_specs=[_row_spec(tm, k_pad), _full_spec((k_pad, c_pad))],
        out_specs=(
            _row_spec(tm, c_pad),
            pl.BlockSpec((8, c_pad), lambda m: (m, 0)),
            pl.BlockSpec((8, c_pad), lambda m: (m, 0)),
        ),
        compiler_params=pltpu.CompilerParams(
            dimension_semantics=("parallel",),        # no cross-tile carry
            vmem_limit_bytes=VMEM_LIMIT_BYTES),
        cost_estimate=pl.CostEstimate(
            flops=int(flops), transcendentals=0,
            bytes_accessed=int(bytes_accessed)),
    )(p, w)


def _bn_apply_call(kernel, args, in_specs, m_pad, tm, c_pad, out_dtype):
    """Elementwise normalize/affine/(shortcut)/ReLU read-back pass."""
    n_mtiles = m_pad // tm
    bytes_accessed = (sum(int(a.size) * a.dtype.itemsize for a in args)
                      + m_pad * c_pad * jnp.dtype(out_dtype).itemsize)
    return pl.pallas_call(
        kernel,
        out_shape=jax.ShapeDtypeStruct((m_pad, c_pad), out_dtype),
        grid=(n_mtiles,),
        in_specs=in_specs,
        out_specs=_row_spec(tm, c_pad),
        compiler_params=pltpu.CompilerParams(
            dimension_semantics=("parallel",),
            vmem_limit_bytes=VMEM_LIMIT_BYTES),
        cost_estimate=pl.CostEstimate(
            flops=4 * m_pad * c_pad, transcendentals=0,
            bytes_accessed=int(bytes_accessed)),
    )(*args)


def _bn_scale_shift(psum, pssq, gamma, beta, m_rows, c_pad):
    """Reduce per-tile partials and fold BN into per-channel scale/shift (tiny)."""
    total = jnp.sum(psum[::8], axis=0)           # rows are replicated x8 per tile
    total2 = jnp.sum(pssq[::8], axis=0)
    mean = total / m_rows
    var = jnp.maximum(total2 / m_rows - mean * mean, 0.0)
    g = jnp.pad(gamma.astype(jnp.float32), (0, c_pad - gamma.shape[0]))
    b = jnp.pad(beta.astype(jnp.float32), (0, c_pad - beta.shape[0]))
    scale = g * lax.rsqrt(var + EPS)
    shift = b - mean * scale
    return scale.reshape(1, c_pad), shift.reshape(1, c_pad)


def _im2col(x_nhwc, ksize, stride, pad):
    # TODO(synk): implicit in-kernel im2col (halo DMAs) would avoid this 9x
    # HBM expansion; kept JAX-side for robustness.
    n, h, w, c = x_nhwc.shape
    xp = jnp.pad(x_nhwc, ((0, 0), (pad, pad), (pad, pad), (0, 0)))
    ho = (h + 2 * pad - ksize) // stride + 1
    wo = (w + 2 * pad - ksize) // stride + 1
    cols = []
    for ky in range(ksize):
        for kx in range(ksize):
            cols.append(xp[:, ky:ky + stride * ho:stride,
                           kx:kx + stride * wo:stride, :])
    patches = jnp.concatenate(cols, axis=-1)            # (n, ho, wo, k*k*c)
    return patches.reshape(n * ho * wo, ksize * ksize * c), ho, wo


@functools.partial(jax.jit, static_argnames=("stride", "tile_m"))
def basic_block_forward(x_nchw, params, stride, tile_m=None):
    x = jnp.transpose(x_nchw, (0, 2, 3, 1)).astype(jnp.float32)   # NHWC
    n, h, w, cin = x.shape
    planes = params["w1"].shape[0]
    has_proj = (stride != 1) or (cin != planes)

    c_pad = _round_up(planes, LANE)
    k1_pad = _round_up(9 * cin, LANE)
    k2_pad = _round_up(9 * planes, LANE)
    cin_pad = _round_up(cin, LANE)

    # ---- im2col for conv1 ---------------------------------------------------
    p1, ho, wo = _im2col(x, 3, stride, 1)                # (M, 9*cin)
    m_rows = n * ho * wo

    # ---- row tile: VMEM-budget derived, multiple of 128 (MXU rows, bf16 pack)
    k_max = max(k1_pad, k2_pad, cin_pad)
    if tile_m is None:
        avail = max(VMEM_BUDGET_BYTES - 4 * k_max * c_pad, 4 * LANE * (k_max + c_pad))
        tile_m = avail // (4 * (k_max + c_pad) + 4)
    tm = max(LANE, min(int(tile_m), 2048))
    tm = (tm // LANE) * LANE
    tm = min(tm, _round_up(m_rows, LANE))
    m_pad = _round_up(m_rows, tm)

    # ---- stage 1: conv1 (3x3, stride, pad=1) -> bn1 -> relu -----------------
    p1p = _pad_to(p1, m_pad, k1_pad).astype(jnp.bfloat16)
    w1 = jnp.transpose(params["w1"], (2, 3, 1, 0)).reshape(9 * cin, planes)
    w1p = _pad_to(w1, k1_pad, c_pad).astype(jnp.bfloat16)

    raw1, s1, q1 = _conv_matmul_stats(p1p, w1p, tm, m_pad, k1_pad, c_pad)
    scale1, shift1 = _bn_scale_shift(s1, q1, params["gamma1"], params["beta1"],
                                     m_rows, c_pad)
    out1_pad = _bn_apply_call(
        _bn_relu_kernel, (raw1, scale1, shift1),
        [_row_spec(tm, c_pad), _full_spec((1, c_pad)), _full_spec((1, c_pad))],
        m_pad, tm, c_pad, jnp.bfloat16)                  # bf16: feeds stage 2

    # ---- stage 2: conv2 (3x3, s=1, pad=1) -> bn2 (+ shortcut) -> relu -------
    # TODO(synk): out1 round-trips through HBM here; conv1->conv2 fusion with a
    # VMEM-resident tile would remove this write + the im2col re-read.
    out1 = out1_pad[:m_rows, :planes].reshape(n, ho, wo, planes)
    p2, _, _ = _im2col(out1, 3, 1, 1)                    # bf16 patches
    p2p = _pad_to(p2, m_pad, k2_pad)
    w2 = jnp.transpose(params["w2"], (2, 3, 1, 0)).reshape(9 * planes, planes)
    w2p = _pad_to(w2, k2_pad, c_pad).astype(jnp.bfloat16)

    raw2, s2, q2 = _conv_matmul_stats(p2p, w2p, tm, m_pad, k2_pad, c_pad)
    scale2, shift2 = _bn_scale_shift(s2, q2, params["gamma2"], params["beta2"],
                                     m_rows, c_pad)

    if has_proj:
        # projection shortcut: 1x1 strided conv + BN (same matmul+stats kernel)
        xs = x[:, ::stride, ::stride, :].reshape(m_rows, cin)
        xsp = _pad_to(xs, m_pad, cin_pad).astype(jnp.bfloat16)
        ws = params["ws"].reshape(planes, cin).T
        wsp = _pad_to(ws, cin_pad, c_pad).astype(jnp.bfloat16)
        raws, ss, qs = _conv_matmul_stats(xsp, wsp, tm, m_pad, cin_pad, c_pad)
        scales, shifts = _bn_scale_shift(ss, qs, params["gammas"], params["betas"],
                                         m_rows, c_pad)
        out_pad = _bn_apply_call(
            _bn2_proj_relu_kernel,
            (raw2, scale2, shift2, raws, scales, shifts),
            [_row_spec(tm, c_pad), _full_spec((1, c_pad)), _full_spec((1, c_pad)),
             _row_spec(tm, c_pad), _full_spec((1, c_pad)), _full_spec((1, c_pad))],
            m_pad, tm, c_pad, jnp.float32)
    else:
        # identity shortcut: added in f32
        xsc = _pad_to(x.reshape(m_rows, cin), m_pad, c_pad)
        out_pad = _bn_apply_call(
            _bn_add_relu_kernel,
            (raw2, scale2, shift2, xsc),
            [_row_spec(tm, c_pad), _full_spec((1, c_pad)), _full_spec((1, c_pad)),
             _row_spec(tm, c_pad)],
            m_pad, tm, c_pad, jnp.float32)

    out = out_pad[:m_rows, :planes].reshape(n, ho, wo, planes)
    return jnp.transpose(out, (0, 3, 1, 2))              # back to NCHW


# --------------------- deterministic parameter init -------------------------

def init_params(key, in_planes, planes, stride):
    ks = jax.random.split(key, 9)
    params = {
        "w1": 0.1 * jax.random.normal(ks[0], (planes, in_planes, 3, 3), jnp.float32),
        "gamma1": 1.0 + 0.1 * jax.random.normal(ks[1], (planes,), jnp.float32),
        "beta1": 0.1 * jax.random.normal(ks[2], (planes,), jnp.float32),
        "w2": 0.1 * jax.random.normal(ks[3], (planes, planes, 3, 3), jnp.float32),
        "gamma2": 1.0 + 0.1 * jax.random.normal(ks[4], (planes,), jnp.float32),
        "beta2": 0.1 * jax.random.normal(ks[5], (planes,), jnp.float32),
    }
    if stride != 1 or in_planes != planes:
        params["ws"] = 0.1 * jax.random.normal(ks[6], (planes, in_planes, 1, 1), jnp.float32)
        params["gammas"] = 1.0 + 0.1 * jax.random.normal(ks[7], (planes,), jnp.float32)
        params["betas"] = 0.1 * jax.random.normal(ks[8], (planes,), jnp.float32)
    return params


# -------------------------- pure-JAX reference ------------------------------

def reference_forward(x_nchw, params, stride):
    def conv(x, w, s, p):
        return lax.conv_general_dilated(
            x, w, (s, s), [(p, p), (p, p)],
            dimension_numbers=("NCHW", "OIHW", "NCHW"))

    def bn(x, g, b):
        mean = jnp.mean(x, axis=(0, 2, 3), keepdims=True)
        var = jnp.mean(jnp.square(x - mean), axis=(0, 2, 3), keepdims=True)
        return ((x - mean) * lax.rsqrt(var + EPS)
                * g.reshape(1, -1, 1, 1) + b.reshape(1, -1, 1, 1))

    out = jax.nn.relu(bn(conv(x_nchw, params["w1"], stride, 1),
                         params["gamma1"], params["beta1"]))
    out = bn(conv(out, params["w2"], 1, 1), params["gamma2"], params["beta2"])
    if stride != 1 or x_nchw.shape[1] != params["w1"].shape[0]:
        sc = bn(conv(x_nchw, params["ws"], stride, 0),
                params["gammas"], params["betas"])
    else:
        sc = x_nchw
    return jax.nn.relu(out + sc)


# --------------------------------- main --------------------------------------

if __name__ == "__main__":
    key = jax.random.PRNGKey(0)
    kx1, kp1, kx2, kp2 = jax.random.split(key, 4)

    # case 1: projection shortcut (stride=2, in_planes != planes)
    x1 = jax.random.normal(kx1, (2, 4, 16, 16), jnp.float32)
    params1 = init_params(kp1, in_planes=4, planes=8, stride=2)
    out1 = basic_block_forward(x1, params1, stride=2)
    jax.block_until_ready(out1)
    ref1 = reference_forward(x1, params1, stride=2)
    assert out1.shape == (2, 8, 8, 8)
    # bf16 MXU operands + bf16 intermediates => looser tolerance vs f32 ref.
    assert jnp.allclose(out1, ref1, rtol=1e-1, atol=1e-1), \
        float(jnp.max(jnp.abs(out1 - ref1)))

    # case 2: identity shortcut; tile_m=128 exercises multi-tile partial stats
    x2 = jax.random.normal(kx2, (2, 8, 16, 16), jnp.float32)
    params2 = init_params(kp2, in_planes=8, planes=8, stride=1)
    out2 = basic_block_forward(x2, params2, stride=1, tile_m=128)
    jax.block_until_ready(out2)
    ref2 = reference_forward(x2, params2, stride=1)
    assert out2.shape == (2, 8, 16, 16)
    assert jnp.allclose(out2, ref2, rtol=1e-1, atol=1e-1), \
        float(jnp.max(jnp.abs(out2 - ref2)))

    print("KERNEL_OK")
</pallas_src>

<mosaic_0001>
module attributes {stable_mosaic.version = 11 : i64} {
  func.func @_matmul_stats_kernel(%arg0: i32, %arg1: memref<128x128xbf16, #tpu.memory_space<vmem>>, %arg2: memref<128x128xbf16, #tpu.memory_space<vmem>>, %arg3: memref<128x128xbf16, #tpu.memory_space<vmem>>, %arg4: memref<8x128xf32, #tpu.memory_space<vmem>>, %arg5: memref<8x128xf32, #tpu.memory_space<vmem>>) attributes {dimension_semantics = [#tpu.dimension_semantics<parallel>], iteration_bounds = array<i64: 1>, scalar_prefetch = 0 : i64, scratch_operands = 0 : i64, tpu.core_type = #tpu.core_type<tc>, window_params = [{transform_indices = @transform_0, window_bounds = array<i64: 128, 128>}, {pipeline_mode = #tpu.pipeline_mode<synchronous>, transform_indices = @transform_1, window_bounds = array<i64: 128, 128>}, {transform_indices = @transform_2, window_bounds = array<i64: 128, 128>}, {transform_indices = @transform_3, window_bounds = array<i64: 8, 128>}, {transform_indices = @transform_4, window_bounds = array<i64: 8, 128>}]} {
    %c0 = arith.constant 0 : index
    %c0_0 = arith.constant 0 : index
    %0 = vector.load %arg1[%c0, %c0_0] : memref<128x128xbf16, #tpu.memory_space<vmem>>, vector<128x128xbf16>
    %c0_1 = arith.constant 0 : index
    %c0_2 = arith.constant 0 : index
    %1 = vector.load %arg2[%c0_1, %c0_2] : memref<128x128xbf16, #tpu.memory_space<vmem>>, vector<128x128xbf16>
    %cst = arith.constant dense<0.000000e+00> : vector<128x128xf32>
    %2 = tpu.matmul %0, %1, %cst {dimension_numbers = #tpu.dot_dimension_numbers<[1], [0], [0], [1], [0, 0, 1, 1], [], []>} : vector<128x128xbf16>, vector<128x128xbf16>, vector<128x128xf32> -> vector<128x128xf32>
    %3 = arith.truncf %2 : vector<128x128xf32> to vector<128x128xbf16>
    %c0_3 = arith.constant 0 : index
    %c0_4 = arith.constant 0 : index
    %4 = vector.load %arg3[%c0_3, %c0_4] : memref<128x128xbf16, #tpu.memory_space<vmem>>, vector<128x128xbf16>
    tpu.vector_store %arg3[%c0_3, %c0_4], %3 {strides = array<i32>} : memref<128x128xbf16, #tpu.memory_space<vmem>>, vector<128x128xbf16>,
    %cst_5 = arith.constant dense<0.000000e+00> : vector<128xf32>
    %5 = vector.multi_reduction <add>, %2, %cst_5 [0] : vector<128x128xf32> to vector<128xf32>
    %6 = vector.shape_cast %5 : vector<128xf32> to vector<1x128xf32>
    %7 = arith.mulf %2, %2 : vector<128x128xf32>
    %cst_6 = arith.constant dense<0.000000e+00> : vector<128xf32>
    %8 = vector.multi_reduction <add>, %7, %cst_6 [0] : vector<128x128xf32> to vector<128xf32>
    %9 = vector.shape_cast %8 : vector<128xf32> to vector<1x128xf32>
    %10 = vector.shape_cast %6 : vector<1x128xf32> to vector<1x128xf32>
    %11 = vector.broadcast %10 : vector<1x128xf32> to vector<8x128xf32>
    %c0_7 = arith.constant 0 : index
    %c0_8 = arith.constant 0 : index
    %12 = vector.load %arg4[%c0_7, %c0_8] : memref<8x128xf32, #tpu.memory_space<vmem>>, vector<8x128xf32>
    tpu.vector_store %arg4[%c0_7, %c0_8], %11 {strides = array<i32>} : memref<8x128xf32, #tpu.memory_space<vmem>>, vector<8x128xf32>,
    %13 = vector.shape_cast %9 : vector<1x128xf32> to vector<1x128xf32>
    %14 = vector.broadcast %13 : vector<1x128xf32> to vector<8x128xf32>
    %c0_9 = arith.constant 0 : index
    %c0_10 = arith.constant 0 : index
    %15 = vector.load %arg5[%c0_9, %c0_10] : memref<8x128xf32, #tpu.memory_space<vmem>>, vector<8x128xf32>
    tpu.vector_store %arg5[%c0_9, %c0_10], %14 {strides = array<i32>} : memref<8x128xf32, #tpu.memory_space<vmem>>, vector<8x128xf32>,
    return
  }
  func.func @transform_0(%arg0: i32) -> (i32, i32) {
    %c0_i32 = arith.constant 0 : i32
    %c0_i32_0 = arith.constant 0 : i32
    return %arg0, %c0_i32 : i32, i32
  }
  func.func @transform_1(%arg0: i32) -> (i32, i32) {
    %c0_i32 = arith.constant 0 : i32
    %c0_i32_0 = arith.constant 0 : i32
    %c0_i32_1 = arith.constant 0 : i32
    return %c0_i32, %c0_i32_0 : i32, i32
  }
  func.func @transform_2(%arg0: i32) -> (i32, i32) {
    %c0_i32 = arith.constant 0 : i32
    %c0_i32_0 = arith.constant 0 : i32
    return %arg0, %c0_i32 : i32, i32
  }
  func.func @transform_3(%arg0: i32) -> (i32, i32) {
    %c0_i32 = arith.constant 0 : i32
    %c0_i32_0 = arith.constant 0 : i32
    return %arg0, %c0_i32 : i32, i32
  }
  func.func @transform_4(%arg0: i32) -> (i32, i32) {
    %c0_i32 = arith.constant 0 : i32
    %c0_i32_0 = arith.constant 0 : i32
    return %arg0, %c0_i32 : i32, i32
  }
}

module attributes {stable_mosaic.version = 11 : i64} {
  func.func @_bn_relu_kernel(%arg0: i32, %arg1: memref<128x128xbf16, #tpu.memory_space<vmem>>, %arg2: memref<1x128xf32, #tpu.memory_space<vmem>>, %arg3: memref<1x128xf32, #tpu.memory_space<vmem>>, %arg4: memref<128x128xbf16, #tpu.memory_space<vmem>>) attributes {dimension_semantics = [#tpu.dimension_semantics<parallel>], iteration_bounds = array<i64: 1>, scalar_prefetch = 0 : i64, scratch_operands = 0 : i64, tpu.core_type = #tpu.core_type<tc>, window_params = [{transform_indices = @transform_0, window_bounds = array<i64: 128, 128>}, {pipeline_mode = #tpu.pipeline_mode<synchronous>, transform_indices = @transform_1, window_bounds = array<i64: 1, 128>}, {pipeline_mode = #tpu.pipeline_mode<synchronous>, transform_indices = @transform_2, window_bounds = array<i64: 1, 128>}, {transform_indices = @transform_3, window_bounds = array<i64: 128, 128>}]} {
    %c0 = arith.constant 0 : index
    %c0_0 = arith.constant 0 : index
    %0 = vector.load %arg1[%c0, %c0_0] : memref<128x128xbf16, #tpu.memory_space<vmem>>, vector<128x128xbf16>
    %1 = arith.extf %0 : vector<128x128xbf16> to vector<128x128xf32>
    %c0_1 = arith.constant 0 : index
    %c0_2 = arith.constant 0 : index
    %2 = vector.load %arg2[%c0_1, %c0_2] : memref<1x128xf32, #tpu.memory_space<vmem>>, vector<1x128xf32>
    %3 = vector.broadcast %2 : vector<1x128xf32> to vector<128x128xf32>
    %4 = arith.mulf %1, %3 : vector<128x128xf32>
    %c0_3 = arith.constant 0 : index
    %c0_4 = arith.constant 0 : index
    %5 = vector.load %arg3[%c0_3, %c0_4] : memref<1x128xf32, #tpu.memory_space<vmem>>, vector<1x128xf32>
    %6 = vector.broadcast %5 : vector<1x128xf32> to vector<128x128xf32>
    %7 = arith.addf %4, %6 : vector<128x128xf32>
    %cst = arith.constant 0.000000e+00 : f32
    %8 = vector.broadcast %cst : f32 to vector<128x128xf32>
    %9 = arith.maximumf %7, %8 : vector<128x128xf32>
    %10 = arith.truncf %9 : vector<128x128xf32> to vector<128x128xbf16>
    %c0_5 = arith.constant 0 : index
    %c0_6 = arith.constant 0 : index
    %11 = vector.load %arg4[%c0_5, %c0_6] : memref<128x128xbf16, #tpu.memory_space<vmem>>, vector<128x128xbf16>
    tpu.vector_store %arg4[%c0_5, %c0_6], %10 {strides = array<i32>} : memref<128x128xbf16, #tpu.memory_space<vmem>>, vector<128x128xbf16>,
    return
  }
  func.func @transform_0(%arg0: i32) -> (i32, i32) {
    %c0_i32 = arith.constant 0 : i32
    %c0_i32_0 = arith.constant 0 : i32
    return %arg0, %c0_i32 : i32, i32
  }
  func.func @transform_1(%arg0: i32) -> (i32, i32) {
    %c0_i32 = arith.constant 0 : i32
    %c0_i32_0 = arith.constant 0 : i32
    %c0_i32_1 = arith.constant 0 : i32
    return %c0_i32, %c0_i32_0 : i32, i32
  }
  func.func @transform_2(%arg0: i32) -> (i32, i32) {
    %c0_i32 = arith.constant 0 : i32
    %c0_i32_0 = arith.constant 0 : i32
    %c0_i32_1 = arith.constant 0 : i32
    return %c0_i32, %c0_i32_0 : i32, i32
  }
  func.func @transform_3(%arg0: i32) -> (i32, i32) {
    %c0_i32 = arith.constant 0 : i32
    %c0_i32_0 = arith.constant 0 : i32
    return %arg0, %c0_i32 : i32, i32
  }
}

module attributes {stable_mosaic.version = 11 : i64} {
  func.func @_bn2_proj_relu_kernel(%arg0: i32, %arg1: memref<128x128xbf16, #tpu.memory_space<vmem>>, %arg2: memref<1x128xf32, #tpu.memory_space<vmem>>, %arg3: memref<1x128xf32, #tpu.memory_space<vmem>>, %arg4: memref<128x128xbf16, #tpu.memory_space<vmem>>, %arg5: memref<1x128xf32, #tpu.memory_space<vmem>>, %arg6: memref<1x128xf32, #tpu.memory_space<vmem>>, %arg7: memref<128x128xf32, #tpu.memory_space<vmem>>) attributes {dimension_semantics = [#tpu.dimension_semantics<parallel>], iteration_bounds = array<i64: 1>, scalar_prefetch = 0 : i64, scratch_operands = 0 : i64, tpu.core_type = #tpu.core_type<tc>, window_params = [{transform_indices = @transform_0, window_bounds = array<i64: 128, 128>}, {pipeline_mode = #tpu.pipeline_mode<synchronous>, transform_indices = @transform_1, window_bounds = array<i64: 1, 128>}, {pipeline_mode = #tpu.pipeline_mode<synchronous>, transform_indices = @transform_2, window_bounds = array<i64: 1, 128>}, {transform_indices = @transform_3, window_bounds = array<i64: 128, 128>}, {pipeline_mode = #tpu.pipeline_mode<synchronous>, transform_indices = @transform_4, window_bounds = array<i64: 1, 128>}, {pipeline_mode = #tpu.pipeline_mode<synchronous>, transform_indices = @transform_5, window_bounds = array<i64: 1, 128>}, {transform_indices = @transform_6, window_bounds = array<i64: 128, 128>}]} {
    %c0 = arith.constant 0 : index
    %c0_0 = arith.constant 0 : index
    %0 = vector.load %arg1[%c0, %c0_0] : memref<128x128xbf16, #tpu.memory_space<vmem>>, vector<128x128xbf16>
    %1 = arith.extf %0 : vector<128x128xbf16> to vector<128x128xf32>
    %c0_1 = arith.constant 0 : index
    %c0_2 = arith.constant 0 : index
    %2 = vector.load %arg4[%c0_1, %c0_2] : memref<128x128xbf16, #tpu.memory_space<vmem>>, vector<128x128xbf16>
    %3 = arith.extf %2 : vector<128x128xbf16> to vector<128x128xf32>
    %c0_3 = arith.constant 0 : index
    %c0_4 = arith.constant 0 : index
    %4 = vector.load %arg2[%c0_3, %c0_4] : memref<1x128xf32, #tpu.memory_space<vmem>>, vector<1x128xf32>
    %5 = vector.broadcast %4 : vector<1x128xf32> to vector<128x128xf32>
    %6 = arith.mulf %1, %5 : vector<128x128xf32>
    %c0_5 = arith.constant 0 : index
    %c0_6 = arith.constant 0 : index
    %7 = vector.load %arg3[%c0_5, %c0_6] : memref<1x128xf32, #tpu.memory_space<vmem>>, vector<1x128xf32>
    %8 = vector.broadcast %7 : vector<1x128xf32> to vector<128x128xf32>
    %9 = arith.addf %6, %8 : vector<128x128xf32>
    %c0_7 = arith.constant 0 : index
    %c0_8 = arith.constant 0 : index
    %10 = vector.load %arg5[%c0_7, %c0_8] : memref<1x128xf32, #tpu.memory_space<vmem>>, vector<1x128xf32>
    %11 = vector.broadcast %10 : vector<1x128xf32> to vector<128x128xf32>
    %12 = arith.mulf %3, %11 : vector<128x128xf32>
    %13 = arith.addf %9, %12 : vector<128x128xf32>
    %c0_9 = arith.constant 0 : index
    %c0_10 = arith.constant 0 : index
    %14 = vector.load %arg6[%c0_9, %c0_10] : memref<1x128xf32, #tpu.memory_space<vmem>>, vector<1x128xf32>
    %15 = vector.broadcast %14 : vector<1x128xf32> to vector<128x128xf32>
    %16 = arith.addf %13, %15 : vector<128x128xf32>
    %cst = arith.constant 0.000000e+00 : f32
    %17 = vector.broadcast %cst : f32 to vector<128x128xf32>
    %18 = arith.maximumf %16, %17 : vector<128x128xf32>
    %c0_11 = arith.constant 0 : index
    %c0_12 = arith.constant 0 : index
    %19 = vector.load %arg7[%c0_11, %c0_12] : memref<128x128xf32, #tpu.memory_space<vmem>>, vector<128x128xf32>
    tpu.vector_store %arg7[%c0_11, %c0_12], %18 {strides = array<i32>} : memref<128x128xf32, #tpu.memory_space<vmem>>, vector<128x128xf32>,
    return
  }
  func.func @transform_0(%arg0: i32) -> (i32, i32) {
    %c0_i32 = arith.constant 0 : i32
    %c0_i32_0 = arith.constant 0 : i32
    return %arg0, %c0_i32 : i32, i32
  }
  func.func @transform_1(%arg0: i32) -> (i32, i32) {
    %c0_i32 = arith.constant 0 : i32
    %c0_i32_0 = arith.constant 0 : i32
    %c0_i32_1 = arith.constant 0 : i32
    return %c0_i32, %c0_i32_0 : i32, i32
  }
  func.func @transform_2(%arg0: i32) -> (i32, i32) {
    %c0_i32 = arith.constant 0 : i32
    %c0_i32_0 = arith.constant 0 : i32
    %c0_i32_1 = arith.constant 0 : i32
    return %c0_i32, %c0_i32_0 : i32, i32
  }
  func.func @transform_3(%arg0: i32) -> (i32, i32) {
    %c0_i32 = arith.constant 0 : i32
    %c0_i32_0 = arith.constant 0 : i32
    return %arg0, %c0_i32 : i32, i32
  }
  func.func @transform_4(%arg0: i32) -> (i32, i32) {
    %c0_i32 = arith.constant 0 : i32
    %c0_i32_0 = arith.constant 0 : i32
    %c0_i32_1 = arith.constant 0 : i32
    return %c0_i32, %c0_i32_0 : i32, i32
  }
  func.func @transform_5(%arg0: i32) -> (i32, i32) {
    %c0_i32 = arith.constant 0 : i32
    %c0_i32_0 = arith.constant 0 : i32
    %c0_i32_1 = arith.constant 0 : i32
    return %c0_i32, %c0_i32_0 : i32, i32
  }
  func.func @transform_6(%arg0: i32) -> (i32, i32) {
    %c0_i32 = arith.constant 0 : i32
    %c0_i32_0 = arith.constant 0 : i32
    return %arg0, %c0_i32 : i32, i32
  }
}

</mosaic_0001>

<bundles_post_ra>
// kernel: basic_block_forward.6
= control target key start
LH: loop header
LB: loop body
LE: loop exit
PB: predicated region body
PF: predicated region fallthrough
CT: control target
= control target key end

     0   :  { %s336_s0 = inlined_call_operand.vmem [shape: bf16[128,128], index: 0, kind: input, shape index: {}]   ;;  %s337_s1 = inlined_call_operand.vmem [shape: f32[1,128], index: 1, kind: input, shape index: {}]   ;;  %s338_s2 = inlined_call_operand.vmem [shape: f32[1,128], index: 2, kind: input, shape index: {}]   ;;  %s339_s3 = inlined_call_operand.vmem [shape: bf16[128,128], index: 3, kind: output, shape index: {}]  }
   0x1   :  { %v139_v0 = vld [vmem:[%s336_s0] sm:$0xff]   ;;  %v210_v5 = vld [vmem:[%s336_s0 + $0x8] sm:$0xff]   ;;  %v211_v8 = vld [vmem:[%s336_s0 + $0x10] sm:$0xff]  }
   0x2   :  { %v252_v1 = vld [vmem:[%s337_s1] ss:$0 sm:$0xff]  ;;  %v140_v2 = vunpack.c.l.bf16 %v139_v0  ;;  %v141_v3 = vunpack.c.h.bf16 %v139_v0  ;;  %v144_v6 = vunpack.c.l.bf16 %v210_v5  ;;  %v145_v7 = vunpack.c.h.bf16 %v210_v5  ;;  %v212_v9 = vld [vmem:[%s336_s0 + $0x18] sm:$0xff]   ;;  %v214_v35 = vld [vmem:[%s336_s0 + $0x28] sm:$0xff]  }
   0x3   :  { %v257_v4 = vld [vmem:[%s338_s2] ss:$0 sm:$0xff]  ;;  %v148_v12 = vunpack.c.l.bf16 %v211_v8  ;;  %v149_v13 = vunpack.c.h.bf16 %v211_v8  ;;  %v152_v16 = vunpack.c.l.bf16 %v212_v9  ;;  %v153_v17 = vunpack.c.h.bf16 %v212_v9  ;;  %v215_v40 = vld [vmem:[%s336_s0 + $0x30] sm:$0xff]   ;;  %v216_v45 = vld [vmem:[%s336_s0 + $0x38] sm:$0xff]  }
   0x4   :  { %v50_v10 = vmul.f32 %v252_v1, %v140_v2  ;;  %v51_v11 = vmul.f32 %v252_v1, %v141_v3  ;;  %v52_v14 = vmul.f32 %v252_v1, %v144_v6  ;;  %v53_v15 = vmul.f32 %v252_v1, %v145_v7  ;;  %v213_v26 = vld [vmem:[%s336_s0 + $0x20] sm:$0xff]  }
   0x5   :  { %v54_v20 = vmul.f32 %v252_v1, %v148_v12  ;;  %v55_v21 = vmul.f32 %v252_v1, %v149_v13  ;;  %v56_v24 = vmul.f32 %v252_v1, %v152_v16  ;;  %v57_v25 = vmul.f32 %v252_v1, %v153_v17 }
   0x6   :  { %v70_v18 = vadd.f32 %v257_v4, %v50_v10  ;;  %v71_v19 = vadd.f32 %v257_v4, %v51_v11  ;;  %v72_v22 = vadd.f32 %v257_v4, %v52_v14  ;;  %v73_v23 = vadd.f32 %v257_v4, %v53_v15 }
   0x7   :  { %v74_v29 = vadd.f32 %v257_v4, %v54_v20  ;;  %v75_v30 = vadd.f32 %v257_v4, %v55_v21  ;;  %v76_v33 = vadd.f32 %v257_v4, %v56_v24  ;;  %v77_v34 = vadd.f32 %v257_v4, %v57_v25 }
   0x8   :  { %v86_v27 = vmax.f32 %v70_v18, 0.0  ;;  %v87_v28 = vmax.f32 %v71_v19, 0.0  ;;  %v88_v31 = vmax.f32 %v72_v22, 0.0  ;;  %v89_v32 = vmax.f32 %v73_v23, 0.0 }
   0x9   :  { %v90_v37 = vmax.f32 %v74_v29, 0.0  ;;  %v91_v38 = vmax.f32 %v75_v30, 0.0  ;;  %v156_v39 = vunpack.c.l.bf16 %v213_v26  ;;  %v92_v42 = vmax.f32 %v76_v33, 0.0 }
   0xa   :  { %v173_v36 = vpack.c.bf16 %v87_v28, %v86_v27  ;;  %v178_v41 = vpack.c.bf16 %v89_v32, %v88_v31  ;;  %v93_v43 = vmax.f32 %v77_v34, 0.0  ;;  %v157_v44 = vunpack.c.h.bf16 %v213_v26 }
   0xb   :  { %v183_v46 = vpack.c.bf16 %v91_v38, %v90_v37  ;;  %v58_v47 = vmul.f32 %v252_v1, %v156_v39  ;;  %v160_v48 = vunpack.c.l.bf16 %v214_v35  ;;  %v161_v49 = vunpack.c.h.bf16 %v214_v35 }
   0xc   :  { %174 = vst [vmem:[%s339_s3] sm:$0xff] %v173_v36   ;;  %v188_v50 = vpack.c.bf16 %v93_v43, %v92_v42  ;;  %v59_v51 = vmul.f32 %v252_v1, %v157_v44  ;;  %v164_v52 = vunpack.c.l.bf16 %v215_v40  ;;  %v165_v53 = vunpack.c.h.bf16 %v215_v40 }
   0xd   :  { %217 = vst [vmem:[%s339_s3 + $0x8] sm:$0xff] %v178_v41   ;;  %v78_v54 = vadd.f32 %v257_v4, %v58_v47  ;;  %v60_v55 = vmul.f32 %v252_v1, %v160_v48  ;;  %v61_v56 = vmul.f32 %v252_v1, %v161_v49  ;;  %v168_v57 = vunpack.c.l.bf16 %v216_v45 }
   0xe   :  { %218 = vst [vmem:[%s339_s3 + $0x10] sm:$0xff] %v183_v46   ;;  %v79_v58 = vadd.f32 %v257_v4, %v59_v51  ;;  %v62_v59 = vmul.f32 %v252_v1, %v164_v52  ;;  %v63_v60 = vmul.f32 %v252_v1, %v165_v53  ;;  %v169_v61 = vunpack.c.h.bf16 %v216_v45 }
   0xf   :  { %219 = vst [vmem:[%s339_s3 + $0x18] sm:$0xff] %v188_v50   ;;  %v94_v62 = vmax.f32 %v78_v54, 0.0  ;;  %v80_v63 = vadd.f32 %v257_v4, %v60_v55  ;;  %v81_v0 = vadd.f32 %v257_v4, %v61_v56  ;;  %v64_v2 = vmul.f32 %v252_v1, %v168_v57 }
  0x10   :  { %v95_v3 = vmax.f32 %v79_v58, 0.0  ;;  %v82_v5 = vadd.f32 %v257_v4, %v62_v59  ;;  %v83_v6 = vadd.f32 %v257_v4, %v63_v60  ;;  %v65_v7 = vmul.f32 %v252_v1, %v169_v61 }
  0x11   :  { %v96_v8 = vmax.f32 %v80_v63, 0.0  ;;  %v97_v9 = vmax.f32 %v81_v0, 0.0  ;;  %v84_v10 = vadd.f32 %v257_v4, %v64_v2 }
  0x12   :  { %v193_v11 = vpack.c.bf16 %v95_v3, %v94_v62  ;;  %v98_v12 = vmax.f32 %v82_v5, 0.0  ;;  %v99_v13 = vmax.f32 %v83_v6, 0.0  ;;  %v85_v14 = vadd.f32 %v257_v4, %v65_v7 }
  0x13   :  { %v198_v15 = vpack.c.bf16 %v97_v9, %v96_v8  ;;  %v100_v16 = vmax.f32 %v84_v10, 0.0 }
  0x14   :  { %220 = vst [vmem:[%s339_s3 + $0x20] sm:$0xff] %v193_v11   ;;  %v203_v17 = vpack.c.bf16 %v99_v13, %v98_v12  ;;  %v101_v18 = vmax.f32 %v85_v14, 0.0 }
  0x15   :  { %221 = vst [vmem:[%s339_s3 + $0x28] sm:$0xff] %v198_v15  }
  0x16   :  { %222 = vst [vmem:[%s339_s3 + $0x30] sm:$0xff] %v203_v17   ;;  %v208_v1 = vpack.c.bf16 %v101_v18, %v100_v16 }
  0x18   :  { %223 = vst [vmem:[%s339_s3 + $0x38] sm:$0xff] %v208_v1  }

// kernel: basic_block_forward.8
= control target key start
LH: loop header
LB: loop body
LE: loop exit
PB: predicated region body
PF: predicated region fallthrough
CT: control target
= control target key end

     0   :  { %s555_s1 = inlined_call_operand.vmem [shape: bf16[128,128], index: 1, kind: input, shape index: {}]   ;;  %s556_s0 = inlined_call_operand.vmem [shape: bf16[128,128], index: 0, kind: input, shape index: {}]   ;;  %s557_s2 = inlined_call_operand.vmem [shape: bf16[128,128], index: 2, kind: output, shape index: {0}]   ;;  %s558_s3 = inlined_call_operand.vmem [shape: f32[8,128], index: 3, kind: output, shape index: {1}]   ;;  %s559_s4 = inlined_call_operand.vmem [shape: f32[8,128], index: 4, kind: output, shape index: {2}]  }
   0x1   :  { %v374_v0 = vld [vmem:[%s555_s1 + $0x38] sm:$0xff]  ;;  %v373_v1 = vld [vmem:[%s555_s1 + $0x30] sm:$0xff]  ;;  %v372_v2 = vld [vmem:[%s555_s1 + $0x28] sm:$0xff] }
   0x2   :  { %142 = vmatpush.bf16.msra.mxu0 %v374_v0  ;;  %422 = vmatpush.bf16.msra.mxu1 %v374_v0  ;;  %v371_v3 = vld [vmem:[%s555_s1 + $0x20] sm:$0xff]  ;;  %v370_v4 = vld [vmem:[%s555_s1 + $0x18] sm:$0xff]  ;;  %v369_v5 = vld [vmem:[%s555_s1 + $0x10] sm:$0xff] }
   0x3   :  { %423 = vmatpush.bf16.msra.mxu2 %v374_v0  ;;  %424 = vmatpush.bf16.msra.mxu3 %v374_v0  ;;  %v368_v6 = vld [vmem:[%s555_s1 + $0x8] sm:$0xff]  ;;  %v367_v7 = vld [vmem:[%s555_s1] sm:$0xff]  ;;  %v361_v9 = vld [vmem:[%s556_s0 + $0x10] sm:$0xff] }
   0x4   :  { %v359_v8 = vld [vmem:[%s556_s0] sm:$0xff]  ;;  %v365_v11 = vld [vmem:[%s556_s0 + $0x30] sm:$0xff]  ;;  %v360_v12 = vld [vmem:[%s556_s0 + $0x8] sm:$0xff] }
   0x5   :  { %v363_v10 = vld [vmem:[%s556_s0 + $0x20] sm:$0xff]  ;;  %v362_v13 = vld [vmem:[%s556_s0 + $0x18] sm:$0xff]  ;;  %v364_v14 = vld [vmem:[%s556_s0 + $0x28] sm:$0xff] }
   0x6   :  { %143 = vmatpush.bf16.msra.mxu0 %v373_v1  ;;  %425 = vmatpush.bf16.msra.mxu1 %v373_v1  ;;  %v366_v15 = vld [vmem:[%s556_s0 + $0x38] sm:$0xff] }
   0x7   :  { %426 = vmatpush.bf16.msra.mxu2 %v373_v1  ;;  %427 = vmatpush.bf16.msra.mxu3 %v373_v1 }
   0xa   :  { %144 = vmatpush.bf16.msra.mxu0 %v372_v2  ;;  %428 = vmatpush.bf16.msra.mxu1 %v372_v2 }
   0xb   :  { %429 = vmatpush.bf16.msra.mxu2 %v372_v2  ;;  %430 = vmatpush.bf16.msra.mxu3 %v372_v2 }
   0xe   :  { %145 = vmatpush.bf16.msra.mxu0 %v371_v3  ;;  %431 = vmatpush.bf16.msra.mxu1 %v371_v3 }
   0xf   :  { %432 = vmatpush.bf16.msra.mxu2 %v371_v3  ;;  %433 = vmatpush.bf16.msra.mxu3 %v371_v3 }
  0x12   :  { %146 = vmatpush.bf16.msra.mxu0 %v370_v4  ;;  %434 = vmatpush.bf16.msra.mxu1 %v370_v4 }
  0x13   :  { %435 = vmatpush.bf16.msra.mxu2 %v370_v4  ;;  %436 = vmatpush.bf16.msra.mxu3 %v370_v4 }
  0x16   :  { %147 = vmatpush.bf16.msra.mxu0 %v369_v5  ;;  %437 = vmatpush.bf16.msra.mxu1 %v369_v5 }
  0x17   :  { %438 = vmatpush.bf16.msra.mxu2 %v369_v5  ;;  %439 = vmatpush.bf16.msra.mxu3 %v369_v5 }
  0x1a   :  { %148 = vmatpush.bf16.msra.mxu0 %v368_v6  ;;  %440 = vmatpush.bf16.msra.mxu1 %v368_v6 }
  0x1b   :  { %441 = vmatpush.bf16.msra.mxu2 %v368_v6  ;;  %442 = vmatpush.bf16.msra.mxu3 %v368_v6 }
  0x1e   :  { %149 = vmatpush.bf16.msra.mxu0 %v367_v7  ;;  %443 = vmatpush.bf16.msra.mxu1 %v367_v7 }
  0x1f   :  { %444 = vmatpush.bf16.msra.mxu2 %v367_v7  ;;  %445 = vmatpush.bf16.msra.mxu3 %v367_v7 }
  0x21   :  { %150 = vmatmul.bf16.vlgmr.msra.gmra.mxu0 %v359_v8  ;;  %160 = vmatmul.bf16.vlgmr.msra.gmra.mxu1 %v361_v9 }
  0x22   :  { %170 = vmatmul.bf16.vlgmr.msra.gmra.mxu2 %v363_v10  ;;  %180 = vmatmul.bf16.vlgmr.msra.gmra.mxu3 %v365_v11 }
  0x31   :  { %155 = vmatmul.bf16.gmra.mxu0 %v360_v12  ;;  %165 = vmatmul.bf16.gmra.mxu1 %v362_v13 }
  0x32   :  { %175 = vmatmul.bf16.gmra.mxu2 %v364_v14  ;;  %185 = vmatmul.bf16.gmra.mxu3 %v366_v15 }
  0x9e   :  { %v151_v16 = vpop.f32.mrf.mxu0  ;;  %v161_v17 = vpop.f32.mrf.mxu1 }
  0x9f   :  { %v244_v31 = vmul.f32 %v151_v16, %v151_v16  ;;  %v248_v45 = vmul.f32 %v161_v17, %v161_v17 }
  0xa5   :  { %v171_v18 = vpop.f32.mrf.mxu2  ;;  %v519_v19 = vpop.f32.mrf.mxu3 }
  0xa6   :  { %v153_v20 = vpop.f32.mrf.mxu0  ;;  %v163_v21 = vpop.f32.mrf.mxu1  ;;  %v252_v61 = vmul.f32 %v171_v18, %v171_v18  ;;  %v256_v9 = vmul.f32 %v519_v19, %v519_v19 }
  0xa7   :  { %v378_v22 = vpack.c.bf16 %v153_v20, %v151_v16  ;;  %v388_v23 = vpack.c.bf16 %v163_v21, %v161_v17  ;;  %v245_v30 = vmul.f32 %v153_v20, %v153_v20  ;;  %v223_v33 = vadd.f32 %v153_v20, %v151_v16 }
  0xa8   :  { %v249_v48 = vmul.f32 %v163_v21, %v163_v21 }
  0xa9   :  { %379 = vst [vmem:[%s557_s2] sm:$0xff] %v378_v22   ;;  %v260_v34 = vadd.f32 %v245_v30, %v244_v31 }
  0xaa   :  { %416 = vst [vmem:[%s557_s2 + $0x10] sm:$0xff] %v388_v23  }
  0xad   :  { %v173_v24 = vpop.f32.mrf.mxu2  ;;  %v183_v25 = vpop.f32.mrf.mxu3 }
  0xae   :  { %v156_v26 = vpop.f32.mrf.mxu0  ;;  %v166_v27 = vpop.f32.mrf.mxu1  ;;  %v398_v28 = vpack.c.bf16 %v173_v24, %v171_v18  ;;  %v408_v29 = vpack.c.bf16 %v183_v25, %v519_v19  ;;  %v253_v0 = vmul.f32 %v173_v24, %v173_v24  ;;  %v257_v12 = vmul.f32 %v183_v25, %v183_v25 }
  0xaf   :  { %v246_v32 = vmul.f32 %v156_v26, %v156_v26  ;;  %v224_v35 = vadd.f32 %v223_v33, %v156_v26  ;;  %v250_v51 = vmul.f32 %v166_v27, %v166_v27 }
  0xb0   :  { %418 = vst [vmem:[%s557_s2 + $0x20] sm:$0xff] %v398_v28  }
  0xb1   :  { %420 = vst [vmem:[%s557_s2 + $0x30] sm:$0xff] %v408_v29   ;;  %v261_v38 = vadd.f32 %v260_v34, %v246_v32 }
  0xb5   :  { %v176_v36 = vpop.f32.mrf.mxu2  ;;  %v186_v37 = vpop.f32.mrf.mxu3 }
  0xb6   :  { %v158_v39 = vpop.f32.mrf.mxu0  ;;  %v168_v40 = vpop.f32.mrf.mxu1  ;;  %v254_v4 = vmul.f32 %v176_v36, %v176_v36  ;;  %v258_v16 = vmul.f32 %v186_v37, %v186_v37 }
  0xb7   :  { %v383_v41 = vpack.c.bf16 %v158_v39, %v156_v26  ;;  %v225_v42 = vadd.f32 %v224_v35, %v158_v39  ;;  %v247_v43 = vmul.f32 %v158_v39, %v158_v39  ;;  %v393_v44 = vpack.c.bf16 %v168_v40, %v166_v27 }
  0xb8   :  { %v251_v59 = vmul.f32 %v168_v40, %v168_v40 }
  0xb9   :  { %415 = vst [vmem:[%s557_s2 + $0x8] sm:$0xff] %v383_v41   ;;  %v226_v46 = vadd.f32 %v225_v42, %v161_v17  ;;  %v262_v47 = vadd.f32 %v261_v38, %v247_v43 }
  0xba   :  { %417 = vst [vmem:[%s557_s2 + $0x18] sm:$0xff] %v393_v44  }
  0xbb   :  { %v263_v49 = vadd.f32 %v262_v47, %v248_v45  ;;  %v227_v50 = vadd.f32 %v226_v46, %v163_v21 }
  0xbd   :  { %v228_v52 = vadd.f32 %v227_v50, %v166_v27  ;;  %v264_v53 = vadd.f32 %v263_v49, %v249_v48  ;;  %v178_v54 = vpop.f32.mrf.mxu2  ;;  %v188_v55 = vpop.f32.mrf.mxu3 }
  0xbe   :  { %v403_v56 = vpack.c.bf16 %v178_v54, %v176_v36  ;;  %v413_v57 = vpack.c.bf16 %v188_v55, %v186_v37  ;;  %v255_v8 = vmul.f32 %v178_v54, %v178_v54  ;;  %v259_v21 = vmul.f32 %v188_v55, %v188_v55 }
  0xbf   :  { %v229_v58 = vadd.f32 %v228_v52, %v168_v40  ;;  %v265_v60 = vadd.f32 %v264_v53, %v250_v51 }
  0xc0   :  { %419 = vst [vmem:[%s557_s2 + $0x28] sm:$0xff] %v403_v56  }
  0xc1   :  { %v230_v62 = vadd.f32 %v229_v58, %v171_v18  ;;  %v266_v63 = vadd.f32 %v265_v60, %v251_v59  ;;  %421 = vst [vmem:[%s557_s2 + $0x38] sm:$0xff] %v413_v57  }
  0xc3   :  { %v267_v1 = vadd.f32 %v266_v63, %v252_v61  ;;  %v231_v2 = vadd.f32 %v230_v62, %v173_v24 }
  0xc5   :  { %v232_v3 = vadd.f32 %v231_v2, %v176_v36  ;;  %v268_v5 = vadd.f32 %v267_v1, %v253_v0 }
  0xc7   :  { %v269_v6 = vadd.f32 %v268_v5, %v254_v4  ;;  %v233_v7 = vadd.f32 %v232_v3, %v178_v54 }
  0xc9   :  { %v234_v10 = vadd.f32 %v233_v7, %v519_v19  ;;  %v270_v11 = vadd.f32 %v269_v6, %v255_v8 }
  0xcb   :  { %v271_v13 = vadd.f32 %v270_v11, %v256_v9  ;;  %v235_v14 = vadd.f32 %v234_v10, %v183_v25 }
  0xcd   :  { %v236_v15 = vadd.f32 %v235_v14, %v186_v37  ;;  %v272_v17 = vadd.f32 %v271_v13, %v257_v12 }
  0xcf   :  { %v273_v18 = vadd.f32 %v272_v17, %v258_v16  ;;  %v237_v20 = vadd.f32 %v236_v15, %v188_v55 }
  0xd1   :  { %v238_v22 = vrot.slane %v237_v20, 4  ;;  %v274_v23 = vadd.f32 %v273_v18, %v259_v21 }
  0xd3   :  { %v239_v24 = vadd.f32 %v238_v22, %v237_v20  ;;  %v275_v26 = vrot.slane %v274_v23, 4 }
  0xd5   :  { %v240_v27 = vrot.slane %v239_v24, 2  ;;  %v276_v28 = vadd.f32 %v275_v26, %v274_v23 }
  0xd7   :  { %v241_v29 = vadd.f32 %v240_v27, %v239_v24  ;;  %v277_v30 = vrot.slane %v276_v28, 2 }
  0xd9   :  { %v242_v31 = vrot.slane %v241_v29, 1  ;;  %v278_v19 = vadd.f32 %v277_v30, %v276_v28 }
  0xdb   :  { %v243_v32 = vadd.f32 %v242_v31, %v241_v29  ;;  %v279_v33 = vrot.slane %v278_v19, 1 }
  0xdd   :  { %v280_v34 = vadd.f32 %v279_v33, %v278_v19  ;;  %281 = vst [vmem:[%s558_s3] sm:$0xff] %v243_v32 }
  0xdf   :  { %282 = vst [vmem:[%s559_s4] sm:$0xff] %v280_v34 }

// kernel: basic_block_forward.9
= control target key start
LH: loop header
LB: loop body
LE: loop exit
PB: predicated region body
PF: predicated region fallthrough
CT: control target
= control target key end

     0   :  { %s516_s0 = inlined_call_operand.vmem [shape: bf16[128,128], index: 0, kind: input, shape index: {}]   ;;  %s517_s1 = inlined_call_operand.vmem [shape: f32[1,128], index: 1, kind: input, shape index: {}]   ;;  %s518_s2 = inlined_call_operand.vmem [shape: f32[1,128], index: 2, kind: input, shape index: {}]   ;;  %s519_s3 = inlined_call_operand.vmem [shape: bf16[128,128], index: 3, kind: input, shape index: {}]   ;;  %s520_s4 = inlined_call_operand.vmem [shape: f32[1,128], index: 4, kind: input, shape index: {}]   ;;  %s521_s5 = inlined_call_operand.vmem [shape: f32[1,128], index: 5, kind: input, shape index: {}]   ;;  %s522_s6 = inlined_call_operand.vmem [shape: f32[128,128], index: 6, kind: output, shape index: {}]  }
   0x1   :  { %v220_v0 = vld [vmem:[%s516_s0] sm:$0xff]   ;;  %v283_v11 = vld [vmem:[%s516_s0 + $0x8] sm:$0xff]   ;;  %v284_v17 = vld [vmem:[%s516_s0 + $0x10] sm:$0xff]  }
   0x2   :  { %v252_v1 = vld [vmem:[%s519_s3] sm:$0xff]   ;;  %v221_v2 = vunpack.c.l.bf16 %v220_v0  ;;  %v222_v6 = vunpack.c.h.bf16 %v220_v0  ;;  %v290_v12 = vld [vmem:[%s519_s3 + $0x8] sm:$0xff]   ;;  %v225_v15 = vunpack.c.l.bf16 %v283_v11  ;;  %v291_v18 = vld [vmem:[%s519_s3 + $0x10] sm:$0xff]   ;;  %v226_v22 = vunpack.c.h.bf16 %v283_v11 }
   0x3   :  { %v253_v3 = vunpack.c.l.bf16 %v252_v1  ;;  %v345_v4 = vld [vmem:[%s517_s1] ss:$0 sm:$0xff]  ;;  %v254_v7 = vunpack.c.h.bf16 %v252_v1  ;;  %v257_v16 = vunpack.c.l.bf16 %v290_v12  ;;  %v258_v23 = vunpack.c.h.bf16 %v290_v12  ;;  %v285_v32 = vld [vmem:[%s516_s0 + $0x18] sm:$0xff]  }
   0x4   :  { %v350_v5 = vld [vmem:[%s518_s2] ss:$0 sm:$0xff]  ;;  %v91_v9 = vmul.f32 %v345_v4, %v221_v2  ;;  %v92_v10 = vmul.f32 %v345_v4, %v222_v6  ;;  %v93_v24 = vmul.f32 %v345_v4, %v225_v15  ;;  %v229_v26 = vunpack.c.l.bf16 %v284_v17  ;;  %v292_v41 = vld [vmem:[%s519_s3 + $0x18] sm:$0xff]   ;;  %v287_v6 = vld [vmem:[%s516_s0 + $0x28] sm:$0xff]  }
   0x5   :  { %v355_v8 = vld [vmem:[%s520_s4] ss:$0 sm:$0xff]  ;;  %v261_v27 = vunpack.c.l.bf16 %v291_v18  ;;  %v94_v30 = vmul.f32 %v345_v4, %v226_v22  ;;  %v230_v36 = vunpack.c.h.bf16 %v284_v17  ;;  %v262_v40 = vunpack.c.h.bf16 %v291_v18 }
   0x6   :  { %v131_v13 = vmul.f32 %v355_v8, %v253_v3  ;;  %v132_v14 = vmul.f32 %v355_v8, %v254_v7  ;;  %v111_v19 = vadd.f32 %v350_v5, %v91_v9  ;;  %v377_v20 = vld [vmem:[%s521_s5] ss:$0 sm:$0xff]  ;;  %v112_v21 = vadd.f32 %v350_v5, %v92_v10 }
   0x7   :  { %v133_v25 = vmul.f32 %v355_v8, %v257_v16  ;;  %v134_v31 = vmul.f32 %v355_v8, %v258_v23  ;;  %v113_v33 = vadd.f32 %v350_v5, %v93_v24  ;;  %v95_v34 = vmul.f32 %v345_v4, %v229_v26  ;;  %v286_v58 = vld [vmem:[%s516_s0 + $0x20] sm:$0xff]   ;;  %v294_v16 = vld [vmem:[%s519_s3 + $0x28] sm:$0xff]  }
   0x8   :  { %v147_v28 = vadd.f32 %v131_v13, %v111_v19  ;;  %v148_v29 = vadd.f32 %v132_v14, %v112_v21  ;;  %v135_v35 = vmul.f32 %v355_v8, %v261_v27  ;;  %v114_v39 = vadd.f32 %v350_v5, %v94_v30  ;;  %v293_v59 = vld [vmem:[%s519_s3 + $0x20] sm:$0xff]   ;;  %v288_v30 = vld [vmem:[%s516_s0 + $0x30] sm:$0xff]  }
   0x9   :  { %v149_v42 = vadd.f32 %v133_v25, %v113_v33  ;;  %v115_v43 = vadd.f32 %v350_v5, %v95_v34  ;;  %v96_v44 = vmul.f32 %v345_v4, %v230_v36  ;;  %v233_v45 = vunpack.c.l.bf16 %v285_v32 }
   0xa   :  { %v167_v37 = vadd.f32 %v377_v20, %v147_v28  ;;  %v168_v38 = vadd.f32 %v377_v20, %v148_v29  ;;  %v150_v48 = vadd.f32 %v134_v31, %v114_v39  ;;  %v136_v49 = vmul.f32 %v355_v8, %v262_v40 }
   0xb   :  { %v169_v50 = vadd.f32 %v377_v20, %v149_v42  ;;  %v151_v51 = vadd.f32 %v135_v35, %v115_v43  ;;  %v116_v52 = vadd.f32 %v350_v5, %v96_v44  ;;  %v265_v53 = vunpack.c.l.bf16 %v292_v41  ;;  %v295_v35 = vld [vmem:[%s519_s3 + $0x30] sm:$0xff]  }
   0xc   :  { %v183_v46 = vmax.f32 %v167_v37, 0.0  ;;  %v184_v47 = vmax.f32 %v168_v38, 0.0  ;;  %v170_v54 = vadd.f32 %v377_v20, %v150_v48  ;;  %v97_v55 = vmul.f32 %v345_v4, %v233_v45 }
   0xd   :  { %v234_v56 = vunpack.c.h.bf16 %v285_v32  ;;  %v266_v57 = vunpack.c.h.bf16 %v292_v41  ;;  %v185_v60 = vmax.f32 %v169_v50, 0.0  ;;  %v171_v61 = vadd.f32 %v377_v20, %v151_v51 }
   0xe   :  { %199 = vst [vmem:[%s522_s6] sm:$0xff] %v183_v46  ;;  %v152_v62 = vadd.f32 %v136_v49, %v116_v52  ;;  %v137_v63 = vmul.f32 %v355_v8, %v265_v53  ;;  %v186_v0 = vmax.f32 %v170_v54, 0.0  ;;  %v117_v1 = vadd.f32 %v350_v5, %v97_v55  ;;  %v289_v52 = vld [vmem:[%s516_s0 + $0x38] sm:$0xff]  }
   0xf   :  { %200 = vst [vmem:[%s522_s6 + $0x8] sm:$0xff] %v184_v47  ;;  %v98_v2 = vmul.f32 %v345_v4, %v234_v56  ;;  %v138_v3 = vmul.f32 %v355_v8, %v266_v57  ;;  %v187_v7 = vmax.f32 %v171_v61, 0.0  ;;  %v237_v10 = vunpack.c.l.bf16 %v286_v58  ;;  %v296_v53 = vld [vmem:[%s519_s3 + $0x38] sm:$0xff]  }
  0x10   :  { %201 = vst [vmem:[%s522_s6 + $0x10] sm:$0xff] %v185_v60  ;;  %v172_v9 = vadd.f32 %v377_v20, %v152_v62  ;;  %v269_v11 = vunpack.c.l.bf16 %v293_v59  ;;  %v153_v12 = vadd.f32 %v137_v63, %v117_v1  ;;  %v238_v14 = vunpack.c.h.bf16 %v286_v58 }
  0x11   :  { %202 = vst [vmem:[%s522_s6 + $0x18] sm:$0xff] %v186_v0  ;;  %v118_v13 = vadd.f32 %v350_v5, %v98_v2  ;;  %v270_v15 = vunpack.c.h.bf16 %v293_v59  ;;  %v99_v18 = vmul.f32 %v345_v4, %v237_v10  ;;  %v241_v21 = vunpack.c.l.bf16 %v287_v6 }
  0x12   :  { %203 = vst [vmem:[%s522_s6 + $0x20] sm:$0xff] %v187_v7  ;;  %v188_v17 = vmax.f32 %v172_v9, 0.0  ;;  %v139_v19 = vmul.f32 %v355_v8, %v269_v11  ;;  %v173_v22 = vadd.f32 %v377_v20, %v153_v12  ;;  %v100_v24 = vmul.f32 %v345_v4, %v238_v14 }
  0x13   :  { %v154_v23 = vadd.f32 %v138_v3, %v118_v13  ;;  %v140_v25 = vmul.f32 %v355_v8, %v270_v15  ;;  %v119_v26 = vadd.f32 %v350_v5, %v99_v18  ;;  %v273_v27 = vunpack.c.l.bf16 %v294_v16 }
  0x14   :  { %204 = vst [vmem:[%s522_s6 + $0x28] sm:$0xff] %v188_v17  ;;  %v101_v28 = vmul.f32 %v345_v4, %v241_v21  ;;  %v242_v29 = vunpack.c.h.bf16 %v287_v6  ;;  %v189_v31 = vmax.f32 %v173_v22, 0.0  ;;  %v120_v33 = vadd.f32 %v350_v5, %v100_v24 }
  0x15   :  { %v174_v32 = vadd.f32 %v377_v20, %v154_v23  ;;  %v274_v34 = vunpack.c.h.bf16 %v294_v16  ;;  %v155_v36 = vadd.f32 %v139_v19, %v119_v26  ;;  %v141_v38 = vmul.f32 %v355_v8, %v273_v27 }
  0x16   :  { %v121_v37 = vadd.f32 %v350_v5, %v101_v28  ;;  %v102_v39 = vmul.f32 %v345_v4, %v242_v29  ;;  %205 = vst [vmem:[%s522_s6 + $0x30] sm:$0xff] %v189_v31  ;;  %v156_v41 = vadd.f32 %v140_v25, %v120_v33  ;;  %v245_v43 = vunpack.c.l.bf16 %v288_v30 }
  0x17   :  { %v190_v40 = vmax.f32 %v174_v32, 0.0  ;;  %v142_v42 = vmul.f32 %v355_v8, %v274_v34  ;;  %v175_v44 = vadd.f32 %v377_v20, %v155_v36  ;;  %v277_v47 = vunpack.c.l.bf16 %v295_v35 }
  0x18   :  { %v157_v45 = vadd.f32 %v141_v38, %v121_v37  ;;  %v122_v46 = vadd.f32 %v350_v5, %v102_v39  ;;  %v176_v48 = vadd.f32 %v377_v20, %v156_v41  ;;  %v103_v49 = vmul.f32 %v345_v4, %v245_v43 }
  0x19   :  { %206 = vst [vmem:[%s522_s6 + $0x38] sm:$0xff] %v190_v40  ;;  %v246_v50 = vunpack.c.h.bf16 %v288_v30  ;;  %v278_v51 = vunpack.c.h.bf16 %v295_v35  ;;  %v191_v54 = vmax.f32 %v175_v44, 0.0  ;;  %v143_v57 = vmul.f32 %v355_v8, %v277_v47 }
  0x1a   :  { %v177_v55 = vadd.f32 %v377_v20, %v157_v45  ;;  %v158_v56 = vadd.f32 %v142_v42, %v122_v46  ;;  %v192_v58 = vmax.f32 %v176_v48, 0.0  ;;  %v123_v59 = vadd.f32 %v350_v5, %v103_v49 }
  0x1b   :  { %v104_v60 = vmul.f32 %v345_v4, %v246_v50  ;;  %v144_v61 = vmul.f32 %v355_v8, %v278_v51  ;;  %207 = vst [vmem:[%s522_s6 + $0x40] sm:$0xff] %v191_v54  ;;  %v249_v0 = vunpack.c.l.bf16 %v289_v52  ;;  %v281_v1 = vunpack.c.l.bf16 %v296_v53 }
  0x1c   :  { %v193_v62 = vmax.f32 %v177_v55, 0.0  ;;  %v178_v63 = vadd.f32 %v377_v20, %v158_v56  ;;  %208 = vst [vmem:[%s522_s6 + $0x48] sm:$0xff] %v192_v58  ;;  %v159_v2 = vadd.f32 %v143_v57, %v123_v59  ;;  %v250_v6 = vunpack.c.h.bf16 %v289_v52 }
  0x1d   :  { %v124_v3 = vadd.f32 %v350_v5, %v104_v60  ;;  %v282_v7 = vunpack.c.h.bf16 %v296_v53  ;;  %v105_v10 = vmul.f32 %v345_v4, %v249_v0  ;;  %v145_v11 = vmul.f32 %v355_v8, %v281_v1 }
  0x1e   :  { %209 = vst [vmem:[%s522_s6 + $0x50] sm:$0xff] %v193_v62  ;;  %v194_v9 = vmax.f32 %v178_v63, 0.0  ;;  %v179_v12 = vadd.f32 %v377_v20, %v159_v2  ;;  %v106_v14 = vmul.f32 %v345_v4, %v250_v6 }
  0x1f   :  { %v160_v13 = vadd.f32 %v144_v61, %v124_v3  ;;  %v146_v15 = vmul.f32 %v355_v8, %v282_v7  ;;  %v125_v16 = vadd.f32 %v350_v5, %v105_v10 }
  0x20   :  { %210 = vst [vmem:[%s522_s6 + $0x58] sm:$0xff] %v194_v9  ;;  %v195_v17 = vmax.f32 %v179_v12, 0.0  ;;  %v126_v19 = vadd.f32 %v350_v5, %v106_v14 }
  0x21   :  { %v180_v18 = vadd.f32 %v377_v20, %v160_v13  ;;  %v161_v21 = vadd.f32 %v145_v11, %v125_v16 }
  0x22   :  { %211 = vst [vmem:[%s522_s6 + $0x60] sm:$0xff] %v195_v17  ;;  %v162_v4 = vadd.f32 %v146_v15, %v126_v19 }
  0x23   :  { %v196_v22 = vmax.f32 %v180_v18, 0.0  ;;  %v181_v8 = vadd.f32 %v377_v20, %v161_v21 }
  0x24   :  { %v182_v23 = vadd.f32 %v377_v20, %v162_v4 }
  0x25   :  { %212 = vst [vmem:[%s522_s6 + $0x68] sm:$0xff] %v196_v22  ;;  %v197_v24 = vmax.f32 %v181_v8, 0.0 }
  0x26   :  { %v198_v25 = vmax.f32 %v182_v23, 0.0 }
  0x27   :  { %213 = vst [vmem:[%s522_s6 + $0x70] sm:$0xff] %v197_v24 }
  0x28   :  { %214 = vst [vmem:[%s522_s6 + $0x78] sm:$0xff] %v198_v25 }

</bundles_post_ra>
